<compile_context>
chip_gen: v5e
topology: v5e:2x2
jax: 0.10.0
libtpu: 0.0.40
codegen_flags: <defaults>
</compile_context>

<pallas_src>
import jax
import jax.numpy as jnp
import numpy as np
from jax.experimental import pallas as pl
from jax.experimental.pallas import tpu as pltpu


# ----------------------------- kernels ------------------------------------ #

def gp_stats_kernel(params_ref, x_ref, xsq_ref, X_ref, Xsq_ref, Kinv_ref,
                    KinvYT_ref, Ks_ref, A_ref, stats_ref):
    """Per M-row-tile: K_s, A = K_s @ K_inv, and packed [mean | var | std]."""
    sigma_f2 = params_ref[0]
    inv_two_l2 = params_ref[1]

    x = x_ref[...]                      # (TM, D)
    Xt = X_ref[...]                     # (N, D)
    x_sq = xsq_ref[...]                 # (TM, 1)  (precomputed in wrapper)
    X_sq = Xsq_ref[...]                 # (1, N)   (precomputed, lane-dense)

    # K_s = rbf(x, X); contraction over D with the transpose folded into
    # dot_general (no explicit X.T relayout).
    xXT = jax.lax.dot_general(x, Xt, (((1,), (1,)), ((), ())),
                              preferred_element_type=jnp.float32)   # (TM, N)
    d2 = x_sq + X_sq - 2.0 * xXT
    K_s = sigma_f2 * jnp.exp(-jnp.maximum(d2, 0.0) * inv_two_l2)     # (TM, N)
    Ks_ref[...] = K_s

    # A = K_s @ K_inv, reused for both the covariance kernel and var.
    A = jnp.dot(K_s, Kinv_ref[...], preferred_element_type=jnp.float32)  # (TM, N)
    A_ref[...] = A

    # mean = K_s @ (K_inv @ Y_nn).  KinvYT is (P, N).
    KinvYT = KinvYT_ref[...]
    P = KinvYT_ref.shape[0]
    if P == 1:
        # P=1 matvec: VPU multiply + row reduce instead of a near-empty MXU pass.
        mean = jnp.sum(K_s * KinvYT, axis=1, keepdims=True)          # (TM, 1)
    else:
        mean = jax.lax.dot_general(K_s, KinvYT, (((1,), (1,)), ((), ())),
                                   preferred_element_type=jnp.float32)  # (TM, P)

    # var = diag(K_ss - K_s K_inv K_s^T) = sigma_f2 - rowsum(A * K_s)
    var = sigma_f2 - jnp.sum(A * K_s, axis=1, keepdims=True)         # (TM, 1)
    std = jnp.sqrt(jnp.maximum(var, 0.0))                            # clamp: no NaN

    # Packed lane-dense output slab: [mean (P) | var (1) | std (1) | zero pad].
    stats_ref[...] = jnp.zeros_like(stats_ref)
    stats_ref[:, 0:P] = mean
    stats_ref[:, P:P + 1] = var
    stats_ref[:, P + 1:P + 2] = std


def gp_covar_kernel(params_ref, xi_ref, xj_ref, xsq_i_ref, xsq_j_ref,
                    A_ref, Ksj_ref, covar_ref):
    """covar[i-tile, j-tile] = K_ss_ij - A_i @ K_s_j^T (transpose folded)."""
    sigma_f2 = params_ref[0]
    inv_two_l2 = params_ref[1]

    xi = xi_ref[...]                    # (TM, D)
    xj = xj_ref[...]                    # (TM, D)

    xxT = jax.lax.dot_general(xi, xj, (((1,), (1,)), ((), ())),
                              preferred_element_type=jnp.float32)    # (TM, TM)
    d2 = xsq_i_ref[...] + xsq_j_ref[...] - 2.0 * xxT
    K_ss = sigma_f2 * jnp.exp(-jnp.maximum(d2, 0.0) * inv_two_l2)

    AKsT = jax.lax.dot_general(A_ref[...], Ksj_ref[...],
                               (((1,), (1,)), ((), ())),
                               preferred_element_type=jnp.float32)   # (TM, TM)
    covar_ref[...] = K_ss - AKsT


# ----------------------------- wrapper ------------------------------------- #

def _pick_tile(m):
    """Largest MXU-friendly tile that divides m (256-multiples for v6e/v7x)."""
    for t in (512, 256, 128):
        if m % t == 0:
            return t
    return m


def gp_forward(x, X, K_inv, Y_nn, sigma_f2, lengthscale, return_covar=True):
    """Pallas GP forward: returns (mean, covar, var, std) (covar optional)."""
    M, D = x.shape
    N = X.shape[0]
    P = Y_nn.shape[1]
    TM = _pick_tile(M)
    G = M // TM
    SLAB = max(128, ((P + 2 + 127) // 128) * 128)

    params = jnp.array([sigma_f2, 0.5 / (lengthscale ** 2)], dtype=jnp.float32)

    # x-independent ("set_data"-time) precompute: hoisted out of the kernel.
    KinvYT = jnp.transpose(jnp.dot(K_inv, Y_nn)).astype(jnp.float32)   # (P, N)
    X_sq_row = jnp.sum(X * X, axis=1).reshape(1, N).astype(jnp.float32)

    # Cheap per-call precompute (lane-dense row vector for column broadcast).
    x_sq_col = jnp.sum(x * x, axis=1, keepdims=True).astype(jnp.float32)  # (M, 1)
    x_sq_row = x_sq_col.reshape(1, M)                                     # (1, M)

    K_s, A, stats = pl.pallas_call(
        gp_stats_kernel,
        grid=(G,),
        in_specs=[
            pl.BlockSpec(memory_space=pltpu.SMEM),             # hyperparameters
            pl.BlockSpec((TM, D), lambda i: (i, 0)),           # x row tile
            pl.BlockSpec((TM, 1), lambda i: (i, 0)),           # x_sq column
            pl.BlockSpec((N, D), lambda i: (0, 0)),            # X
            pl.BlockSpec((1, N), lambda i: (0, 0)),            # X_sq (lane-dense)
            pl.BlockSpec((N, N), lambda i: (0, 0)),            # K_inv
            pl.BlockSpec((P, N), lambda i: (0, 0)),            # (K_inv @ Y)^T
        ],
        out_specs=(
            pl.BlockSpec((TM, N), lambda i: (i, 0)),           # K_s
            pl.BlockSpec((TM, N), lambda i: (i, 0)),           # A = K_s @ K_inv
            pl.BlockSpec((TM, SLAB), lambda i: (i, 0)),        # packed stats
        ),
        out_shape=(
            jax.ShapeDtypeStruct((M, N), jnp.float32),
            jax.ShapeDtypeStruct((M, N), jnp.float32),
            jax.ShapeDtypeStruct((M, SLAB), jnp.float32),
        ),
        compiler_params=pltpu.CompilerParams(
            dimension_semantics=("parallel",)),
    )(params, x, x_sq_col, X, X_sq_row, K_inv, KinvYT)

    mean = stats[:, 0:P]
    var = stats[:, P:P + 1]
    std = stats[:, P + 1:P + 2]

    if not return_covar:
        return mean, var, std

    covar = pl.pallas_call(
        gp_covar_kernel,
        grid=(G, G),
        in_specs=[
            pl.BlockSpec(memory_space=pltpu.SMEM),             # hyperparameters
            pl.BlockSpec((TM, D), lambda i, j: (i, 0)),        # x row tile
            pl.BlockSpec((TM, D), lambda i, j: (j, 0)),        # x col tile
            pl.BlockSpec((TM, 1), lambda i, j: (i, 0)),        # x_sq rows
            pl.BlockSpec((1, TM), lambda i, j: (0, j)),        # x_sq cols (lane-dense)
            pl.BlockSpec((TM, N), lambda i, j: (i, 0)),        # A (row tile)
            pl.BlockSpec((TM, N), lambda i, j: (j, 0)),        # K_s (col tile)
        ],
        out_specs=pl.BlockSpec((TM, TM), lambda i, j: (i, j)),
        out_shape=jax.ShapeDtypeStruct((M, M), jnp.float32),
        compiler_params=pltpu.CompilerParams(
            dimension_semantics=("parallel", "parallel")),
    )(params, x, x, x_sq_col, x_sq_row, A, K_s)

    return mean, covar, var, std


# ----------------------------- reference / demo ---------------------------- #

def _rbf_ref(A, B, sigma_f2, lengthscale):
    d2 = (jnp.sum(A * A, 1, keepdims=True)
          + jnp.sum(B * B, 1, keepdims=True).T
          - 2.0 * A @ B.T)
    return sigma_f2 * jnp.exp(-jnp.maximum(d2, 0.0) * 0.5 / (lengthscale ** 2))


if __name__ == "__main__":
    key = jax.random.PRNGKey(0)
    k1, k2, k3 = jax.random.split(key, 3)

    # Small shapes consistent with the module: multi-input, single-output GP.
    N, M, D, P = 16, 8, 8, 1
    X = jax.random.normal(k1, (N, D), dtype=jnp.float32)     # training inputs
    Y_nn = jax.random.normal(k2, (N, P), dtype=jnp.float32)  # training targets
    x = jax.random.normal(k3, (M, D), dtype=jnp.float32)     # test inputs

    # Deterministic hyperparameters (module __init__: sigma_n, kernel params).
    sigma_n = 0.3
    sigma_f2 = 1.0
    lengthscale = 1.0
    eps = 1e-4
    reg = 1e-5

    # --- set_data / _update_k glue (plain JAX) ---
    var_n = jnp.clip(jnp.asarray(sigma_n, jnp.float32) ** 2, eps, 1e5)
    K = _rbf_ref(X, X, sigma_f2, lengthscale)
    K = 0.5 * (K + K.T)
    K = K + (reg + var_n) * jnp.eye(N, dtype=jnp.float32)
    K_inv = jnp.linalg.inv(K)

    # --- Pallas forward ---
    mean, covar, var, std = gp_forward(x, X, K_inv, Y_nn, sigma_f2, lengthscale)
    jax.block_until_ready((mean, covar, var, std))

    # --- pure-JAX reference check ---
    K_s = _rbf_ref(x, X, sigma_f2, lengthscale)
    K_ss = _rbf_ref(x, x, sigma_f2, lengthscale)
    mean_r = K_s @ (K_inv @ Y_nn)
    covar_r = K_ss - K_s @ (K_inv @ K_s.T)
    var_r = jnp.diag(covar_r).reshape(-1, 1)
    std_r = jnp.sqrt(jnp.maximum(var_r, 0.0))

    np.testing.assert_allclose(np.asarray(mean), np.asarray(mean_r), rtol=2e-3, atol=2e-3)
    np.testing.assert_allclose(np.asarray(covar), np.asarray(covar_r), rtol=2e-3, atol=2e-3)
    np.testing.assert_allclose(np.asarray(var), np.asarray(var_r), rtol=2e-3, atol=2e-3)
    np.testing.assert_allclose(np.asarray(std), np.asarray(std_r), rtol=2e-3, atol=2e-3)

    print("KERNEL_OK")
</pallas_src>

<mosaic_0001>
module attributes {stable_mosaic.version = 11 : i64} {
  func.func @gp_stats_kernel(%arg0: i32, %arg1: memref<2xf32, #tpu.memory_space<smem>>, %arg2: memref<8x8xf32, #tpu.memory_space<vmem>>, %arg3: memref<8x1xf32, #tpu.memory_space<vmem>>, %arg4: memref<16x8xf32, #tpu.memory_space<vmem>>, %arg5: memref<1x16xf32, #tpu.memory_space<vmem>>, %arg6: memref<16x16xf32, #tpu.memory_space<vmem>>, %arg7: memref<1x16xf32, #tpu.memory_space<vmem>>, %arg8: memref<8x16xf32, #tpu.memory_space<vmem>>, %arg9: memref<8x16xf32, #tpu.memory_space<vmem>>, %arg10: memref<8x128xf32, #tpu.memory_space<vmem>>) attributes {dimension_semantics = [#tpu.dimension_semantics<parallel>], iteration_bounds = array<i64: 1>, scalar_prefetch = 0 : i64, scratch_operands = 0 : i64, tpu.core_type = #tpu.core_type<tc>, window_params = [{transform_indices = @transform_0, window_bounds = array<i64: 2>}, {transform_indices = @transform_1, window_bounds = array<i64: 8, 8>}, {transform_indices = @transform_2, window_bounds = array<i64: 8, 1>}, {pipeline_mode = #tpu.pipeline_mode<synchronous>, transform_indices = @transform_3, window_bounds = array<i64: 16, 8>}, {pipeline_mode = #tpu.pipeline_mode<synchronous>, transform_indices = @transform_4, window_bounds = array<i64: 1, 16>}, {pipeline_mode = #tpu.pipeline_mode<synchronous>, transform_indices = @transform_5, window_bounds = array<i64: 16, 16>}, {pipeline_mode = #tpu.pipeline_mode<synchronous>, transform_indices = @transform_6, window_bounds = array<i64: 1, 16>}, {transform_indices = @transform_7, window_bounds = array<i64: 8, 16>}, {transform_indices = @transform_8, window_bounds = array<i64: 8, 16>}, {transform_indices = @transform_9, window_bounds = array<i64: 8, 128>}]} {
    %c0 = arith.constant 0 : index
    %0 = memref.load %arg1[%c0] : memref<2xf32, #tpu.memory_space<smem>>
    %c1 = arith.constant 1 : index
    %1 = memref.load %arg1[%c1] : memref<2xf32, #tpu.memory_space<smem>>
    %c0_0 = arith.constant 0 : index
    %c0_1 = arith.constant 0 : index
    %2 = vector.load %arg2[%c0_0, %c0_1] : memref<8x8xf32, #tpu.memory_space<vmem>>, vector<8x8xf32>
    %c0_2 = arith.constant 0 : index
    %c0_3 = arith.constant 0 : index
    %3 = vector.load %arg4[%c0_2, %c0_3] : memref<16x8xf32, #tpu.memory_space<vmem>>, vector<16x8xf32>
    %c0_4 = arith.constant 0 : index
    %c0_5 = arith.constant 0 : index
    %4 = vector.load %arg3[%c0_4, %c0_5] : memref<8x1xf32, #tpu.memory_space<vmem>>, vector<8x1xf32>
    %c0_6 = arith.constant 0 : index
    %c0_7 = arith.constant 0 : index
    %5 = vector.load %arg5[%c0_6, %c0_7] : memref<1x16xf32, #tpu.memory_space<vmem>>, vector<1x16xf32>
    %cst = arith.constant dense<0.000000e+00> : vector<8x16xf32>
    %6 = tpu.matmul %2, %3, %cst {dimension_numbers = #tpu.dot_dimension_numbers<[1], [1], [0], [0], [0, 0, 1, 0], [], []>} : vector<8x8xf32>, vector<16x8xf32>, vector<8x16xf32> -> vector<8x16xf32>
    %7 = vector.broadcast %4 : vector<8x1xf32> to vector<8x16xf32>
    %8 = vector.broadcast %5 : vector<1x16xf32> to vector<8x16xf32>
    %9 = arith.addf %7, %8 : vector<8x16xf32>
    %cst_8 = arith.constant 2.000000e+00 : f32
    %10 = vector.broadcast %cst_8 : f32 to vector<8x16xf32>
    %11 = arith.mulf %10, %6 : vector<8x16xf32>
    %12 = arith.subf %9, %11 : vector<8x16xf32>
    %cst_9 = arith.constant 0.000000e+00 : f32
    %13 = vector.broadcast %cst_9 : f32 to vector<8x16xf32>
    %14 = arith.maximumf %12, %13 : vector<8x16xf32>
    %cst_10 = arith.constant 0.000000e+00 : f32
    %15 = vector.broadcast %cst_10 : f32 to vector<8x16xf32>
    %16 = arith.subf %15, %14 : vector<8x16xf32>
    %17 = vector.broadcast %1 : f32 to vector<8x16xf32>
    %18 = arith.mulf %16, %17 : vector<8x16xf32>
    %19 = math.exp %18 : vector<8x16xf32>
    %20 = vector.broadcast %0 : f32 to vector<8x16xf32>
    %21 = arith.mulf %20, %19 : vector<8x16xf32>
    %c0_11 = arith.constant 0 : index
    %c0_12 = arith.constant 0 : index
    %22 = vector.load %arg8[%c0_11, %c0_12] : memref<8x16xf32, #tpu.memory_space<vmem>>, vector<8x16xf32>
    tpu.vector_store %arg8[%c0_11, %c0_12], %21 {strides = array<i32>} : memref<8x16xf32, #tpu.memory_space<vmem>>, vector<8x16xf32>,
    %c0_13 = arith.constant 0 : index
    %c0_14 = arith.constant 0 : index
    %23 = vector.load %arg6[%c0_13, %c0_14] : memref<16x16xf32, #tpu.memory_space<vmem>>, vector<16x16xf32>
    %cst_15 = arith.constant dense<0.000000e+00> : vector<8x16xf32>
    %24 = tpu.matmul %21, %23, %cst_15 {dimension_numbers = #tpu.dot_dimension_numbers<[1], [0], [0], [1], [0, 0, 1, 1], [], []>} : vector<8x16xf32>, vector<16x16xf32>, vector<8x16xf32> -> vector<8x16xf32>
    %c0_16 = arith.constant 0 : index
    %c0_17 = arith.constant 0 : index
    %25 = vector.load %arg9[%c0_16, %c0_17] : memref<8x16xf32, #tpu.memory_space<vmem>>, vector<8x16xf32>
    tpu.vector_store %arg9[%c0_16, %c0_17], %24 {strides = array<i32>} : memref<8x16xf32, #tpu.memory_space<vmem>>, vector<8x16xf32>,
    %c0_18 = arith.constant 0 : index
    %c0_19 = arith.constant 0 : index
    %26 = vector.load %arg7[%c0_18, %c0_19] : memref<1x16xf32, #tpu.memory_space<vmem>>, vector<1x16xf32>
    %27 = vector.broadcast %26 : vector<1x16xf32> to vector<8x16xf32>
    %28 = arith.mulf %21, %27 : vector<8x16xf32>
    %cst_20 = arith.constant dense<0.000000e+00> : vector<8xf32>
    %29 = vector.multi_reduction <add>, %28, %cst_20 [1] : vector<8x16xf32> to vector<8xf32>
    %30 = vector.shape_cast %29 : vector<8xf32> to vector<8x1xf32>
    %31 = arith.mulf %24, %21 : vector<8x16xf32>
    %cst_21 = arith.constant dense<0.000000e+00> : vector<8xf32>
    %32 = vector.multi_reduction <add>, %31, %cst_21 [1] : vector<8x16xf32> to vector<8xf32>
    %33 = vector.shape_cast %32 : vector<8xf32> to vector<8x1xf32>
    %34 = vector.broadcast %0 : f32 to vector<8x1xf32>
    %35 = arith.subf %34, %33 : vector<8x1xf32>
    %cst_22 = arith.constant 0.000000e+00 : f32
    %36 = vector.broadcast %cst_22 : f32 to vector<8x1xf32>
    %37 = arith.maximumf %35, %36 : vector<8x1xf32>
    %38 = math.sqrt %37 : vector<8x1xf32>
    %cst_23 = arith.constant 0.000000e+00 : f32
    %39 = vector.broadcast %cst_23 : f32 to vector<8x128xf32>
    %c0_24 = arith.constant 0 : index
    %c0_25 = arith.constant 0 : index
    %40 = vector.load %arg10[%c0_24, %c0_25] : memref<8x128xf32, #tpu.memory_space<vmem>>, vector<8x128xf32>
    tpu.vector_store %arg10[%c0_24, %c0_25], %39 {strides = array<i32>} : memref<8x128xf32, #tpu.memory_space<vmem>>, vector<8x128xf32>,
    %c0_26 = arith.constant 0 : index
    %c0_27 = arith.constant 0 : index
    %41 = vector.load %arg10[%c0_26, %c0_27] : memref<8x128xf32, #tpu.memory_space<vmem>>, vector<8x1xf32>
    tpu.vector_store %arg10[%c0_26, %c0_27], %30 {strides = array<i32>} : memref<8x128xf32, #tpu.memory_space<vmem>>, vector<8x1xf32>,
    %c0_28 = arith.constant 0 : index
    %c1_29 = arith.constant 1 : index
    %42 = vector.load %arg10[%c0_28, %c1_29] : memref<8x128xf32, #tpu.memory_space<vmem>>, vector<8x1xf32>
    tpu.vector_store %arg10[%c0_28, %c1_29], %35 {strides = array<i32>} : memref<8x128xf32, #tpu.memory_space<vmem>>, vector<8x1xf32>,
    %c0_30 = arith.constant 0 : index
    %c2 = arith.constant 2 : index
    %43 = vector.load %arg10[%c0_30, %c2] : memref<8x128xf32, #tpu.memory_space<vmem>>, vector<8x1xf32>
    tpu.vector_store %arg10[%c0_30, %c2], %38 {strides = array<i32>} : memref<8x128xf32, #tpu.memory_space<vmem>>, vector<8x1xf32>,
    return
  }
  func.func @transform_0(%arg0: i32) -> i32 {
    %c0_i32 = arith.constant 0 : i32
    %c0_i32_0 = arith.constant 0 : i32
    return %c0_i32 : i32
  }
  func.func @transform_1(%arg0: i32) -> (i32, i32) {
    %c0_i32 = arith.constant 0 : i32
    %c0_i32_0 = arith.constant 0 : i32
    return %arg0, %c0_i32 : i32, i32
  }
  func.func @transform_2(%arg0: i32) -> (i32, i32) {
    %c0_i32 = arith.constant 0 : i32
    %c0_i32_0 = arith.constant 0 : i32
    return %arg0, %c0_i32 : i32, i32
  }
  func.func @transform_3(%arg0: i32) -> (i32, i32) {
    %c0_i32 = arith.constant 0 : i32
    %c0_i32_0 = arith.constant 0 : i32
    %c0_i32_1 = arith.constant 0 : i32
    return %c0_i32, %c0_i32_0 : i32, i32
  }
  func.func @transform_4(%arg0: i32) -> (i32, i32) {
    %c0_i32 = arith.constant 0 : i32
    %c0_i32_0 = arith.constant 0 : i32
    %c0_i32_1 = arith.constant 0 : i32
    return %c0_i32, %c0_i32_0 : i32, i32
  }
  func.func @transform_5(%arg0: i32) -> (i32, i32) {
    %c0_i32 = arith.constant 0 : i32
    %c0_i32_0 = arith.constant 0 : i32
    %c0_i32_1 = arith.constant 0 : i32
    return %c0_i32, %c0_i32_0 : i32, i32
  }
  func.func @transform_6(%arg0: i32) -> (i32, i32) {
    %c0_i32 = arith.constant 0 : i32
    %c0_i32_0 = arith.constant 0 : i32
    %c0_i32_1 = arith.constant 0 : i32
    return %c0_i32, %c0_i32_0 : i32, i32
  }
  func.func @transform_7(%arg0: i32) -> (i32, i32) {
    %c0_i32 = arith.constant 0 : i32
    %c0_i32_0 = arith.constant 0 : i32
    return %arg0, %c0_i32 : i32, i32
  }
  func.func @transform_8(%arg0: i32) -> (i32, i32) {
    %c0_i32 = arith.constant 0 : i32
    %c0_i32_0 = arith.constant 0 : i32
    return %arg0, %c0_i32 : i32, i32
  }
  func.func @transform_9(%arg0: i32) -> (i32, i32) {
    %c0_i32 = arith.constant 0 : i32
    %c0_i32_0 = arith.constant 0 : i32
    return %arg0, %c0_i32 : i32, i32
  }
}

</mosaic_0001>

<bundles_post_ra>
// kernel: tpu_custom_call.1
= control target key start
LH: loop header
LB: loop body
LE: loop exit
PB: predicated region body
PF: predicated region fallthrough
CT: control target
= control target key end

     0   :  { %15 = vsyncpa [#allocation4], 0  ;;  %s417_s0 = inlined_call_operand.vmem [shape: f32[2], index: 0, kind: input, shape index: {}]   ;;  %s418_s1 = inlined_call_operand.vmem [shape: f32[8,8], index: 1, kind: input, shape index: {}]   ;;  %s419_s2 = inlined_call_operand.vmem [shape: f32[8,1], index: 2, kind: input, shape index: {}]   ;;  %s420_s3 = inlined_call_operand.vmem [shape: f32[16,8], index: 3, kind: input, shape index: {}]   ;;  %s421_s4 = inlined_call_operand.vmem [shape: f32[1,16], index: 4, kind: input, shape index: {}]   ;;  %s422_s5 = inlined_call_operand.vmem [shape: f32[16,16], index: 5, kind: input, shape index: {}]   ;;  %s423_s6 = inlined_call_operand.vmem [shape: f32[1,16], index: 6, kind: input, shape index: {}]   ;;  %s424_s7 = inlined_call_operand.hbm [shape: f32[8,16], index: 7, kind: output, shape index: {0}]   ;;  %s425_s8 = inlined_call_operand.hbm [shape: f32[8,16], index: 8, kind: output, shape index: {1}]   ;;  %s426_s9 = inlined_call_operand.hbm [shape: f32[8,128], index: 9, kind: output, shape index: {2}]  }
   0x1   :  { %16 = vsyncpa [#allocation3], 0 }
   0x2   :  { %17 = vsyncpa [#allocation7], 0  ;;  %s23_s11 = sshll.u32 %s417_s0, 4  ;;  %s317_s12 = smov [#allocation2]   ;;  %s24_s11 = int_to_ptr.vmem [resolvable:$true] %s23_s11 }
   0x3   :  { %26 = dma.vmem_to_smem %s24_s11, 16, %s317_s12, [#allocation4]  }
   0x4   :  { %311 = dma.done.wait [#allocation4], 16  }
   0x5   :  { %312 = vsyncadd [#allocation4], 4294967280 }
   0x6   :  { %43 = sfence }
   0x7   :  { %v48_v0 = vld [vmem:[%s420_s3 + $0x8] sm:$0xff]  ;;  %vm51_vm0 = vcmask 64512   ;;  %v318_v1 = vmov 0   ;;  %v49_v2 = vld [vmem:[%s419_s2] sm:$0xff]  ;;  %v319_v7 = vmov 0.0   ;;  %s209_s24 = sld [smem:[#allocation2 + $0x1]] }
   0x8   :  { %210 = vmatpush.xpose.msk.msra.mxu0 %vm51_vm0, %v48_v0  ;;  %220 = vset.pattern.permute.xlu0 %v318_v1  ;;  %v47_v3 = vld [vmem:[%s420_s3] sm:$0xff]  ;;  %v103_v5 = vld [vmem:[%s422_s5 + $0x8] sm:$0xff]  ;;  %154 = vst [vmem:[#allocation8] sm:$0xff] %v319_v7  ;;  %vm100_vm1 = vcmask 130048   ;;  %vm155_vm2 = vcmask 7168   ;;  %s179_s27 = sshll.u32 %s425_s8, 4  ;;  %s180_s27 = int_to_ptr.hbm [resolvable:$true] %s179_s27 }
   0x9   :  { %83 = vperm.xlu0 %220, %v49_v2   ;;  %v46_v4 = vld [vmem:[%s418_s1] sm:$0xff]  ;;  %121 = vmatpush.msra.mxu1 %v103_v5  ;;  %s397_s1 = sld [smem:[#allocation2]]  ;;  %s320_s28 = smov [#allocation6]   ;;  %vm157_vm3 = vcmask 15368   ;;  %vm159_vm5 = vcmask 23568  }
   0xa   :  { %v102_v6 = vld [vmem:[%s422_s5] sm:$0xff]  ;;  %s321_s29 = smov [#allocation5]   ;;  %s168_s12 = sshll.u32 %s424_s7, 4  ;;  %s169_s12 = int_to_ptr.hbm [resolvable:$true] %s168_s12 }
   0xb   :  { %122 = vmatpush.msra.mxu1 %v102_v6  ;;  %v221_v8 = vld [vmem:[%s421_s4] ss:$0 sm:$0xff]  ;;  %s166_s30 = sshll.u32 %s321_s29, 4  ;;  %s322_s7 = smov [#allocation8]   ;;  %s167_s30 = int_to_ptr.vmem [resolvable:$true] %s166_s30 }
   0xc   :  { %211 = vmatpush.xpose.msk.msra.mxu0 %vm51_vm0, %v47_v3  ;;  %v222_v20 = vld [vmem:[%s423_s6] ss:$0 sm:$0xff]  ;;  %s177_s6 = sshll.u32 %s320_s28, 4  ;;  %s188_s8 = sshll.u32 %s322_s7, 4  ;;  %s178_s6 = int_to_ptr.vmem [resolvable:$true] %s177_s6  ;;  %s189_s8 = int_to_ptr.vmem [resolvable:$true] %s188_s8 }
   0xd   :  { %v94_v15 = vstv %s209_s24  ;;  %s190_s15 = sshll.u32 %s426_s9, 4  ;;  %s191_s15 = int_to_ptr.hbm [resolvable:$true] %s190_s15 }
   0xf   :  { %212 = vmatmul.msk.f32.vlgmr.msra.gmra.mxu0 %vm51_vm0, %v46_v4  ;;  %v98_v19 = vstv %s397_s1 }
  0x7b   :  { %v84_v9 = vpop.permute.xlu0 %83 }
  0x7c   :  { %v89_v10 = vadd.f32 %v221_v8, %v84_v9 }
  0x8c   :  { %v78_v11 = vpop.f32.mrf.mxu0 }
  0x8d   :  { %v90_v12 = vmul.f32 2.0, %v78_v11 }
  0x8f   :  { %v91_v13 = vsub.f32 %v89_v10, %v90_v12 }
  0x91   :  { %v92_v14 = vmax.f32 %v91_v13, 0.0 }
  0x93   :  { %v93_v16 = vsub.f32 0.0, %v92_v14 }
  0x95   :  { %v95_v17 = vmul.f32 %v94_v15, %v93_v16 }
  0x97   :  { %v96_v18 = vmul.f32 1.442695, %v95_v17 }
  0x99   :  { %223 = vpow2.f32 %v96_v18 }
  0x9f   :  { %v224_v21 = vpop.eup %223 }
  0xa0   :  { %v99_v22 = vmul.f32 %v224_v21, %v98_v19 }
  0xa2   :  { %213 = vmatmul.msk.f32.vlgmr.msra.gmra.mxu1 %vm100_vm1, %v99_v22  ;;  %101 = vst.msk [vmem:[#allocation5] sm:$0xff] %vm100_vm1, %v99_v22  ;;  %v132_v23 = vmul.f32 %v222_v20, %v99_v22 }
  0xa3   :  { %171 = dma.vmem_to_hbm [thread:$0]  %s167_s30, 128, %s169_s12, [#allocation3]  }
  0xa4   :  { %v133_v24 = vsel %vm100_vm1, %v132_v23, 0.0 }
  0xa5   :  { %134 = vadd.xlane.f32.xlu1 %v133_v24 }
 0x118   :  { %v135_v25 = vpop.xlane.xlu1 %134 }
 0x119   :  { %156 = vst.msk [vmem:[#allocation8] sm:$0xff] %vm155_vm2, %v135_v25 }
 0x11f   :  { %v124_v26 = vpop.f32.mrf.mxu1 }
 0x120   :  { %127 = vst.msk [vmem:[#allocation6] sm:$0xff] %vm100_vm1, %v124_v26  ;;  %v136_v27 = vmul.f32 %v124_v26, %v99_v22 }
 0x121   :  { %182 = dma.vmem_to_hbm [thread:$0]  %s178_s6, 128, %s180_s27, [#allocation7]  }
 0x122   :  { %v137_v28 = vsel %vm100_vm1, %v136_v27, 0.0 }
 0x123   :  { %138 = vadd.xlane.f32.xlu0 %v137_v28 }
 0x196   :  { %v139_v29 = vpop.xlane.xlu0 %138 }
 0x197   :  { %v140_v30 = vsub.f32 %v98_v19, %v139_v29 }
 0x199   :  { %v141_v31 = vmax.f32 %v140_v30, 0.0  ;;  %158 = vst.msk [vmem:[#allocation8] sm:$0xff] %vm157_vm3, %v140_v30 }
 0x19b   :  { %225 = vrsqrt.f32 %v141_v31  ;;  %vm149_vm4 = vcmp.eq.f32.partialorder %v141_v31, inf  ;;  %v152_v39 = vand.u32 2147483648, %v141_v31  ;;  %vm151_vm6 = vcmp.eq.f32.partialorder %v141_v31, 0.0 }
 0x1a1   :  { %v226_v32 = vpop.eup %225 }
 0x1a2   :  { %v143_v33 = vmul.f32 %v226_v32, %v141_v31 }
 0x1a4   :  { %v144_v34 = vmul.f32 %v226_v32, %v143_v33 }
 0x1a6   :  { %v145_v35 = vmul.f32 0.5, %v144_v34 }
 0x1a8   :  { %v146_v36 = vsub.f32 1.5, %v145_v35 }
 0x1aa   :  { %v147_v37 = vmul.f32 %v226_v32, %v146_v36 }
 0x1ac   :  { %v148_v38 = vmul.f32 %v147_v37, %v141_v31 }
 0x1ae   :  { %v150_v40 = vsel %vm149_vm4, %v141_v31, %v148_v38 }
 0x1af   :  { %v153_v41 = vsel %vm151_vm6, %v152_v39, %v150_v40 }
 0x1b0   :  { %160 = vst.msk [vmem:[#allocation8] sm:$0xff] %vm159_vm5, %v153_v41 }
 0x1b1   :  { %193 = dma.vmem_to_hbm [thread:$0]  %s189_s8, 128, %s191_s15, [#allocation7]  }
 0x1b2   :  { %313 = dma.done.wait [#allocation3], 128  }
 0x1b3   :  { %314 = vsyncadd [#allocation3], 4294967168 }
 0x1b4   :  { %315 = dma.done.wait [#allocation7], 256  }
 0x1b5   :  { %316 = vsyncadd [#allocation7], 4294967040 }
 0x1b6   :  { %206 = vsyncpa [#allocation3], 1 }
 0x1b7   :  { %207 = vsyncpa [#allocation7], 1 }
 0x1b8   :  { %208 = vsyncpa [#allocation4], 1 }

</bundles_post_ra>
